<compile_context>
chip_gen: v7x
topology: tpu7x:2x2x1
jax: 0.10.0
libtpu: 0.0.40
codegen_flags: <defaults>
</compile_context>

<pallas_src>
import functools

import jax
import jax.numpy as jnp
from jax.experimental import pallas as pl
from jax.experimental.pallas import tpu as pltpu


# ----------------------------------------------------------------------------
# Kernels
# ----------------------------------------------------------------------------
def _se_kernel_chw(x_ref, w1t_ref, w2t_ref, bias_ref, o_ref, *, inv_hw):
    """x block: (Bt, C, HW) -- spatial on the lane axis."""
    x = x_ref[...]

    # Squeeze: global average pool over the spatial (lane) axis; f32
    # accumulation without materializing an f32 copy of the whole tile.
    pooled = jnp.sum(x, axis=-1, dtype=jnp.float32) * inv_hw            # (Bt, C)

    # Excitation FCs on the MXU (M=Bt is small, but K=C / N=Cr are the real
    # dimensions; no (Bt, Cr, C) VPU intermediates).
    h = jnp.dot(pooled, w1t_ref[...], preferred_element_type=jnp.float32)   # (Bt, Cr)
    h = jnp.maximum(h, 0.0)
    z = jnp.dot(h, w2t_ref[...], preferred_element_type=jnp.float32)        # (Bt, C)
    attn = jax.nn.sigmoid(z + bias_ref[...])                                # (Bt, C)

    # Channel-wise scale in the activation's native dtype.
    o_ref[...] = x * attn.astype(x.dtype)[:, :, None]


def _se_kernel_hwc(x_ref, w1t_ref, w2t_ref, bias_ref, o_ref, *, inv_hw):
    """x block: (Bt, HW, C) -- channels on the lane axis (lane-dense even when
    HW % 128 != 0, e.g. the 7x7 / 14x14 stages)."""
    x = x_ref[...]
    pooled = jnp.sum(x, axis=1, dtype=jnp.float32) * inv_hw             # (Bt, C)
    h = jnp.dot(pooled, w1t_ref[...], preferred_element_type=jnp.float32)   # (Bt, Cr)
    h = jnp.maximum(h, 0.0)
    z = jnp.dot(h, w2t_ref[...], preferred_element_type=jnp.float32)        # (Bt, C)
    attn = jax.nn.sigmoid(z + bias_ref[...])                                # (Bt, C)
    o_ref[...] = x * attn.astype(x.dtype)[:, None, :]


# ----------------------------------------------------------------------------
# Wrapper
# ----------------------------------------------------------------------------
# Safe on v7x (64 MiB VMEM / TC); raise to 64-96 MiB on v5e / v6e (128 MiB).
_DEFAULT_VMEM_LIMIT = 48 * 1024 * 1024


def _pick_batch_tile(B, xblk_bytes, w_bytes, vmem_limit):
    """Largest divisor of B such that the pipelined footprint
        4 * x_block   (in + out, each double-buffered)
      + 2 * weights   (grid-invariant operands, default double-buffering)
    fits in ~3/4 of the vmem limit.  Prefer >= 2 grid steps when B >= 2 so
    both v7x TensorCores get work."""
    budget = int(0.75 * vmem_limit) - 2 * w_bytes
    cap = min(budget // 4, 8 << 20)          # >~4 MiB blocks already sit at the HBM roofline knee
    cap = max(cap, xblk_bytes)               # always admit at least one batch element
    divisors = [d for d in range(1, B + 1) if B % d == 0]
    fitting = [d for d in divisors if d * xblk_bytes <= cap] or [1]
    bt = max(fitting)
    if B >= 2 and B // bt < 2:
        smaller = [d for d in fitting if B // d >= 2]
        if smaller:
            bt = max(smaller)
    return bt


def se_block(x, w1, w2, gamma, beta, running_mean, running_var, eps=1e-5,
             data_format="NCHW", vmem_limit_bytes=_DEFAULT_VMEM_LIMIT):
    """SEBlock forward (BatchNorm2d in eval mode, folded into FC2).

    x:  (B, C, H, W) if data_format == "NCHW", else (B, H, W, C)
    w1: (C//r, C)   first 1x1 conv weight (squeezed)
    w2: (C, C//r)   second 1x1 conv weight (squeezed)
    gamma/beta/running_mean/running_var: (C,) BatchNorm2d params / stats
    """
    if data_format == "NCHW":
        B, C, H, W = x.shape
    else:
        B, H, W, C = x.shape
    HW = H * W
    Cr = w1.shape[0]

    # Fold BatchNorm (eval) into the second FC, once, in f32.
    scale = gamma.astype(jnp.float32) * jax.lax.rsqrt(
        running_var.astype(jnp.float32) + eps)                           # (C,)
    w1t = jnp.transpose(w1.astype(jnp.float32))                          # (C, Cr)
    w2t = jnp.transpose(w2.astype(jnp.float32) * scale[:, None])         # (Cr, C)
    bias = (beta.astype(jnp.float32)
            - running_mean.astype(jnp.float32) * scale).reshape(1, C)

    itemsize = jnp.dtype(x.dtype).itemsize
    xblk_bytes = C * HW * itemsize
    w_bytes = (C * Cr + Cr * C + C) * 4
    bt = _pick_batch_tile(B, xblk_bytes, w_bytes, vmem_limit_bytes)
    # Never let the compiler run out of scoped VMEM: cover the real footprint.
    vmem_limit = max(vmem_limit_bytes,
                     4 * bt * xblk_bytes + 2 * w_bytes + (8 << 20))
    grid = (B // bt,)

    if data_format == "NCHW":
        xf = x.reshape(B, C, HW)            # lane axis = HW (best when HW % 128 == 0)
        kernel = functools.partial(_se_kernel_chw, inv_hw=1.0 / HW)
        blk = (bt, C, HW)
    else:
        xf = x.reshape(B, HW, C)            # lane axis = C (lane-dense for 7x7 / 14x14)
        kernel = functools.partial(_se_kernel_hwc, inv_hw=1.0 / HW)
        blk = (bt, HW, C)

    cost = pl.CostEstimate(
        flops=3 * B * C * HW + 4 * B * C * Cr,
        transcendentals=B * C,
        bytes_accessed=2 * B * C * HW * itemsize + 2 * w_bytes,
    )

    out = pl.pallas_call(
        kernel,
        out_shape=jax.ShapeDtypeStruct(xf.shape, x.dtype),
        grid=grid,
        in_specs=[
            pl.BlockSpec(blk, lambda b: (b, 0, 0)),      # x: Bt batch elements
            # Grid-invariant operands (fetched once); their default 2x
            # buffering is charged to the Bt budget above instead of using
            # pl.Buffered(1), keeping the lowering simple and portable.
            pl.BlockSpec((C, Cr), lambda b: (0, 0)),     # fc1 weight (transposed)
            pl.BlockSpec((Cr, C), lambda b: (0, 0)),     # fc2 weight (BN-folded, transposed)
            pl.BlockSpec((1, C), lambda b: (0, 0)),      # BN-folded bias
        ],
        out_specs=pl.BlockSpec(blk, lambda b: (b, 0, 0)),
        compiler_params=pltpu.CompilerParams(
            # TODO(synk): confirm in xprof that the batch grid axis is sharded
            # across both v7x TensorCores; if not, add an explicit
            # CORE_PARALLEL leading axis / core_map split of the batch.
            dimension_semantics=("parallel",),
            vmem_limit_bytes=vmem_limit,
        ),
        cost_estimate=cost,
    )(xf, w1t, w2t, bias)

    if data_format == "NCHW":
        return out.reshape(B, C, H, W)
    return out.reshape(B, H, W, C)


# ----------------------------------------------------------------------------
# Pure-JAX reference (same semantics as the PyTorch SEBlock, BN in eval mode)
# ----------------------------------------------------------------------------
def se_block_ref(x, w1, w2, gamma, beta, running_mean, running_var, eps=1e-5):
    pooled = jnp.mean(x, axis=(2, 3), keepdims=True)              # (B, C, 1, 1)
    h = jnp.einsum('oc,bcij->boij', w1, pooled)
    h = jnp.maximum(h, 0.0)
    z = jnp.einsum('oc,bcij->boij', w2, h)
    g = gamma.reshape(1, -1, 1, 1)
    b = beta.reshape(1, -1, 1, 1)
    m = running_mean.reshape(1, -1, 1, 1)
    v = running_var.reshape(1, -1, 1, 1)
    attn = jax.nn.sigmoid((z - m) / jnp.sqrt(v + eps) * g + b)
    return x * attn


# ----------------------------------------------------------------------------
if __name__ == "__main__":
    key = jax.random.PRNGKey(0)

    def make_params(k, C, Cr):
        kw1, kw2, kg, kb, km, kv = jax.random.split(k, 6)
        w1 = 0.1 * jax.random.normal(kw1, (Cr, C), dtype=jnp.float32)
        w2 = 0.1 * jax.random.normal(kw2, (C, Cr), dtype=jnp.float32)
        gamma = 1.0 + 0.05 * jax.random.normal(kg, (C,), dtype=jnp.float32)
        beta = 0.05 * jax.random.normal(kb, (C,), dtype=jnp.float32)
        rmean = 0.1 * jax.random.normal(km, (C,), dtype=jnp.float32)
        rvar = 1.0 + 0.1 * jax.nn.softplus(
            jax.random.normal(kv, (C,), dtype=jnp.float32))
        return w1, w2, gamma, beta, rmean, rvar

    k1, k2, kx1, kx2 = jax.random.split(key, 4)

    # Case 1: layer3-like small shape, H*W multiple of 128 -> NCHW path.
    B, C, H, W, r = 2, 128, 16, 16, 16
    x = jax.random.normal(kx1, (B, C, H, W), dtype=jnp.float32)
    p = make_params(k1, C, C // r)
    out = jax.block_until_ready(se_block(x, *p))
    ref = se_block_ref(x, *p)
    assert out.shape == x.shape
    err = jnp.max(jnp.abs(out - ref))
    assert jnp.allclose(out, ref, atol=2e-3, rtol=2e-3), f"NCHW max abs err {err}"

    # Case 2: layer4-like small shape (7x7 spatial, H*W = 49) using the
    # channels-last kernel with C on the lane axis.  The transpose below is
    # only test plumbing; in a real NHWC pipeline the data already has this
    # layout (otherwise the HBM transpose would cancel the bandwidth win).
    B2, C2, H2, W2, r2 = 2, 256, 7, 7, 16
    x2 = jax.random.normal(kx2, (B2, C2, H2, W2), dtype=jnp.float32)
    p2 = make_params(k2, C2, C2 // r2)
    x2_nhwc = jnp.transpose(x2, (0, 2, 3, 1))
    out2 = jax.block_until_ready(se_block(x2_nhwc, *p2, data_format="NHWC"))
    ref2 = se_block_ref(x2, *p2)
    out2_nchw = jnp.transpose(out2, (0, 3, 1, 2))
    assert out2.shape == x2_nhwc.shape
    err2 = jnp.max(jnp.abs(out2_nchw - ref2))
    assert jnp.allclose(out2_nchw, ref2, atol=2e-3, rtol=2e-3), \
        f"NHWC max abs err {err2}"

    print("KERNEL_OK")
</pallas_src>

<mosaic_0001>
module attributes {stable_mosaic.version = 11 : i64} {
  func.func @_se_kernel_chw(%arg0: i32, %arg1: memref<1x128x256xf32, #tpu.memory_space<vmem>>, %arg2: memref<128x8xf32, #tpu.memory_space<vmem>>, %arg3: memref<8x128xf32, #tpu.memory_space<vmem>>, %arg4: memref<1x128xf32, #tpu.memory_space<vmem>>, %arg5: memref<1x128x256xf32, #tpu.memory_space<vmem>>) attributes {dimension_semantics = [#tpu.dimension_semantics<parallel>], iteration_bounds = array<i64: 2>, scalar_prefetch = 0 : i64, scratch_operands = 0 : i64, tpu.core_type = #tpu.core_type<tc>, window_params = [{transform_indices = @transform_0, window_bounds = array<i64: 1, 128, 256>}, {pipeline_mode = #tpu.pipeline_mode<synchronous>, transform_indices = @transform_1, window_bounds = array<i64: 128, 8>}, {pipeline_mode = #tpu.pipeline_mode<synchronous>, transform_indices = @transform_2, window_bounds = array<i64: 8, 128>}, {pipeline_mode = #tpu.pipeline_mode<synchronous>, transform_indices = @transform_3, window_bounds = array<i64: 1, 128>}, {transform_indices = @transform_4, window_bounds = array<i64: 1, 128, 256>}]} {
    %c0 = arith.constant 0 : index
    %c0_0 = arith.constant 0 : index
    %c0_1 = arith.constant 0 : index
    %0 = vector.load %arg1[%c0, %c0_0, %c0_1] : memref<1x128x256xf32, #tpu.memory_space<vmem>>, vector<1x128x256xf32>
    %cst = arith.constant dense<0.000000e+00> : vector<1x128xf32>
    %1 = vector.multi_reduction <add>, %0, %cst [2] : vector<1x128x256xf32> to vector<1x128xf32>
    %cst_2 = arith.constant 3.906250e-03 : f32
    %2 = vector.broadcast %cst_2 : f32 to vector<1x128xf32>
    %3 = arith.mulf %1, %2 : vector<1x128xf32>
    %c0_3 = arith.constant 0 : index
    %c0_4 = arith.constant 0 : index
    %4 = vector.load %arg2[%c0_3, %c0_4] : memref<128x8xf32, #tpu.memory_space<vmem>>, vector<128x8xf32>
    %cst_5 = arith.constant dense<0.000000e+00> : vector<1x8xf32>
    %5 = tpu.matmul %3, %4, %cst_5 {dimension_numbers = #tpu.dot_dimension_numbers<[1], [0], [0], [1], [0, 0, 1, 1], [], []>} : vector<1x128xf32>, vector<128x8xf32>, vector<1x8xf32> -> vector<1x8xf32>
    %cst_6 = arith.constant 0.000000e+00 : f32
    %6 = vector.broadcast %cst_6 : f32 to vector<1x8xf32>
    %7 = arith.maximumf %5, %6 : vector<1x8xf32>
    %c0_7 = arith.constant 0 : index
    %c0_8 = arith.constant 0 : index
    %8 = vector.load %arg3[%c0_7, %c0_8] : memref<8x128xf32, #tpu.memory_space<vmem>>, vector<8x128xf32>
    %cst_9 = arith.constant dense<0.000000e+00> : vector<1x128xf32>
    %9 = tpu.matmul %7, %8, %cst_9 {dimension_numbers = #tpu.dot_dimension_numbers<[1], [0], [0], [1], [0, 0, 1, 1], [], []>} : vector<1x8xf32>, vector<8x128xf32>, vector<1x128xf32> -> vector<1x128xf32>
    %c0_10 = arith.constant 0 : index
    %c0_11 = arith.constant 0 : index
    %10 = vector.load %arg4[%c0_10, %c0_11] : memref<1x128xf32, #tpu.memory_space<vmem>>, vector<1x128xf32>
    %11 = arith.addf %9, %10 : vector<1x128xf32>
    %12 = arith.negf %11 : vector<1x128xf32>
    %13 = math.exp %12 : vector<1x128xf32>
    %cst_12 = arith.constant 1.000000e+00 : f32
    %14 = vector.broadcast %cst_12 : f32 to vector<1x128xf32>
    %15 = arith.addf %14, %13 : vector<1x128xf32>
    %16 = arith.divf %14, %15 : vector<1x128xf32>
    %17 = vector.shape_cast %16 : vector<1x128xf32> to vector<1x128x1xf32>
    %18 = vector.broadcast %17 : vector<1x128x1xf32> to vector<1x128x256xf32>
    %19 = arith.mulf %0, %18 : vector<1x128x256xf32>
    %c0_13 = arith.constant 0 : index
    %c0_14 = arith.constant 0 : index
    %c0_15 = arith.constant 0 : index
    %20 = vector.load %arg5[%c0_13, %c0_14, %c0_15] : memref<1x128x256xf32, #tpu.memory_space<vmem>>, vector<1x128x256xf32>
    tpu.vector_store %arg5[%c0_13, %c0_14, %c0_15], %19 {strides = array<i32>} : memref<1x128x256xf32, #tpu.memory_space<vmem>>, vector<1x128x256xf32>,
    return
  }
  func.func @transform_0(%arg0: i32) -> (i32, i32, i32) {
    %c0_i32 = arith.constant 0 : i32
    %c0_i32_0 = arith.constant 0 : i32
    %c0_i32_1 = arith.constant 0 : i32
    return %arg0, %c0_i32, %c0_i32_0 : i32, i32, i32
  }
  func.func @transform_1(%arg0: i32) -> (i32, i32) {
    %c0_i32 = arith.constant 0 : i32
    %c0_i32_0 = arith.constant 0 : i32
    %c0_i32_1 = arith.constant 0 : i32
    return %c0_i32, %c0_i32_0 : i32, i32
  }
  func.func @transform_2(%arg0: i32) -> (i32, i32) {
    %c0_i32 = arith.constant 0 : i32
    %c0_i32_0 = arith.constant 0 : i32
    %c0_i32_1 = arith.constant 0 : i32
    return %c0_i32, %c0_i32_0 : i32, i32
  }
  func.func @transform_3(%arg0: i32) -> (i32, i32) {
    %c0_i32 = arith.constant 0 : i32
    %c0_i32_0 = arith.constant 0 : i32
    %c0_i32_1 = arith.constant 0 : i32
    return %c0_i32, %c0_i32_0 : i32, i32
  }
  func.func @transform_4(%arg0: i32) -> (i32, i32, i32) {
    %c0_i32 = arith.constant 0 : i32
    %c0_i32_0 = arith.constant 0 : i32
    %c0_i32_1 = arith.constant 0 : i32
    return %arg0, %c0_i32, %c0_i32_0 : i32, i32, i32
  }
}

</mosaic_0001>

<bundles_post_ra>
// kernel: tpu_custom_call.1
= control target key start
LH: loop header
LB: loop body
LE: loop exit
PB: predicated region body
PF: predicated region fallthrough
CT: control target
= control target key end

     0   :  { %9 = vsyncpa [#allocation3], 0  ;;  %s1572_s0 = inlined_call_operand.hbm [shape: f32[2,128,256], index: 0, kind: input, shape index: {}]   ;;  %s1573_s1 = inlined_call_operand.vmem [shape: f32[128,8], index: 1, kind: input, shape index: {}]   ;;  %s1574_s2 = inlined_call_operand.vmem [shape: f32[8,128], index: 2, kind: input, shape index: {}]   ;;  %s1575_s3 = inlined_call_operand.vmem [shape: f32[1,128], index: 3, kind: input, shape index: {}]   ;;  %s1576_s4 = inlined_call_operand.hbm [shape: f32[2,128,256], index: 4, kind: output, shape index: {}]  }
   0x1   :  { %11 = vsyncpa [#allocation3 + $0x1], 0 }
   0x2   :  { %12 = vsyncpa [#allocation4], 0 }
   0x3   :  { %14 = vsyncpa [#allocation4 + $0x1], 0  ;;  %s1117_s15 = smov 0   ;;  %s1119_s16 = smov 0  }
   0x4   :  { %s1121_s17 = smov 0   ;;  %s1123_s18 = smov 0  }
   0x5 LB: > { %s1138_s19 = sadd.s32 4294967295, %s1081_s18   ;;  %s827_s20 = sadd.s32 4294967294, %s1081_s18   ;;  %s1081_s18 = sphi %s1123_s18, %s1589_s18   ;;  %s1077_s17 = sphi %s1121_s17, %s1588_s17   ;;  %s1073_s16 = sphi %s1119_s16, %s1587_s16   ;;  %s1069_s15 = sphi %s1117_s15, %s1586_s15  }
   0x6   : > { %s1142_s21 = sadd.s32 1, %s1081_s18   ;;  %s27_s22 = sadd.s32 1, %s1077_s17 }
   0x7   : > { %s24_s23 = ssub.s32 %s1081_s18, %s1142_s21  ;;  %p34_p0 = scmp.ne.s32.totalorder %s1077_s17, %s1073_s16 }
   0x8   : > { %p25_p1 = scmp.eq.s32.totalorder %s24_s23, 0  ;;  %p35_p2 = scmp.eq.s32.totalorder %s1081_s18, 0 }
   0x9   : > { %p40_p3 = scmp.ne.s32.totalorder %s1073_s16, %s1069_s15  ;;  %p41_p4 = scmp.eq.s32.totalorder %s1138_s19, 0 }
   0xa   : > { %s1154_s24 = scalar_select %p25_p1, %s1077_s17, %s27_s22  }
   0xb   : > { %p1156_p5 = por %p35_p2, %p34_p0  ;;  %p1160_p6 = por %p41_p4, %p40_p3 }
   0xc   : > { %p127_p7 = scmp.eq.s32.totalorder %s1138_s19, 1  ;;  %p133_p8 = scmp.eq.s32.totalorder %s827_s20, 1 }
   0xd   : > { %p940_p10 = scmp.lt.s32.totalorder %s1081_s18, 2  ;;  %s162_s29 = sand.u32 1, %s1077_s17  }
   0xe   : > { %p1167_p11 = por %p127_p7, %p34_p0  ;;  %p1171_p12 = por %p133_p8, %p40_p3 }
   0xf   : > { %s843_s30 = sshll.u32 %s1081_s18, 12  ;;  %s830_s5 = sshll.u32 %s162_s29, 8 }
  0x10   : > { %s1580_s27 = scalar_select %p1167_p11, 1, 0 }
  0x11   : > { %s1581_s28 = scalar_select %p1171_p12, 1, 0 }
  0x12   : > { %s1180_s8 = scalar_lea.hbm %s1572_s0, %s843_s30  ;;  %s166_s9 = scalar_lea.vmem [#allocation2], %s830_s5 }
  0x13   : > { %s173_s10 = sshll.u32 %s166_s9, 4  ;;  %p1184_p13 = pnand %p940_p10, %p1156_p5  ;;  %s1188_s10 = int_to_ptr.vmem [resolvable:$true] %s173_s10 }
  0x14   : > { %s1190_s12 = scalar_lea.sflag [#allocation3], %s162_s29  ;;  %s985_s13 = scalar_lea.hbm %s1180_s8, 4096 }
  0x15   : > { %p986_p0 = scmp.ne.s32.totalorder %s1180_s8, %s985_s13  ;;  %p987_p1 = pneg %p1184_p13 }
  0x16   : > { %s990_s22 = scalar_lea.hbm %s1572_s0, 8192  ;;  %p991_p4 = scmp.lt.u32.totalorder %s1180_s8, %s1572_s0 }
  0x17   : > { %p988_p2 = pnand %p987_p1, %p986_p0  ;;  %p992_p5 = scmp.lt.u32.totalorder %s990_s22, %s985_s13 }
  0x18   : > { %p994_p8 = scmp.lt.u32.totalorder %s985_s13, %s1180_s8 }
  0x19   : > { %p989_p3 = pneg %p988_p2  ;;  %p993_p7 = por %p992_p5, %p991_p4 }
  0x1b   : > { %p995_p10 = por %p994_p8, %p993_p7 }
  0x1d   : > { %p996_p9 = pnand %p995_p10, %p989_p3 }
  0x1f   : > { %999 = shalt.err (!%p996_p9)
}
  0x20   : > { %s1000_s29 = scalar_lea.vmem %s1188_s10, 4096  ;;  %s1083_s30 = smov [#allocation2]  }
  0x21   : > { %p1001_p0 = scmp.ne.s32.totalorder %s1188_s10, %s1000_s29  ;;  %s1005_s5 = sshll.u32 %s1083_s30, 4  ;;  %s1006_s5 = int_to_ptr.vmem [resolvable:$false] %s1005_s5 }
  0x22   : > { %s1007_s6 = scalar_lea.vmem %s1006_s5, 8192  ;;  %p1008_p11 = scmp.lt.s32.totalorder %s1188_s10, %s1006_s5 }
  0x23   : > { %p1003_p2 = pnand %p1001_p0, %p987_p1  ;;  %p1009_p4 = scmp.lt.s32.totalorder %s1007_s6, %s1000_s29 }
  0x25   : > { %p1004_p12 = pneg %p1003_p2  ;;  %p1010_p5 = por %p1009_p4, %p1008_p11 }
  0x27   : > { %p1011_p7 = pnand %p1010_p5, %p1004_p12 }
  0x29   : > { %1014 = shalt.err (!%p1011_p7)
}
  0x2a   : > { %s1084_s7 = smov 256   ;;  %s1085_s9 = smov 16  }
  0x2b   : > { %935 = dma.hbm_to_vmem [thread:$0]  (!%p1184_p13), %s1180_s8, 4096, %s1188_s10, %s1190_s12, %s1084_s7, %s1084_s7, %s1085_s9  }
  0x2c   : > { %p833_p9 = scmp.ge.s32.totalorder %s1081_s18, 1  ;;  %p181_p1 = scmp.lt.s32.totalorder %s1081_s18, 3 }
  0x2e   : > { %p182_p3 = pnand %p833_p9, %p181_p1 }
  0x2f   : > { %s1221_s13 = sand.u32 (!%p182_p3), 1, %s1073_s16  }
  0x30   : > { %185 = sbr.rel (%p182_p3) target bundleno = 855 (0x357), region = 36  ;;  %s834_s14 = sshll.u32 (!%p182_p3), %s1221_s13, 8 }
  0x31   : > { %s188_s20 = scalar_lea.sflag (!%p182_p3), [#allocation3], %s1221_s13  ;;  %s1227_s22 = scalar_lea.vmem (!%p182_p3), [#allocation2], %s834_s14 }
  0x37   : > { %1060 = dma.done.wait (%p1160_p6), %s188_s20, 4096  }
  0x38   : > { %1062 = vsyncadd (%p1160_p6), %s188_s20, 4294963200  ;;  %v1234_v0 = vld [vmem:[%s1227_s22] sm:$0xff]  ;;  %v1237_v1 = vld [vmem:[%s1227_s22 + $0x8] sm:$0xff]  ;;  %v1086_v38 = vmov 0.0|0.0   ;;  %vm1087_vm0 = vmmov 0   ;;  %vm355_vm1 = vcmask 130112  }
  0x39   : > { %v1240_v2 = vld [vmem:[%s1227_s22 + $0x20] sm:$0xff]  ;;  %v248_v3 = vadd.f32 %v1237_v1, %v1234_v0  ;;  %v1245_v4 = vld [vmem:[%s1227_s22 + $0x28] sm:$0xff]  ;;  %v1248_v5 = vld [vmem:[%s1227_s22 + $0x10] sm:$0xff]  ;;  %904 = vmatprep.subr.bf16.mxu0 %v1086_v38  ;;  %vm362_vm2 = vcmask 195712   ;;  %vm369_vm3 = vcmask 261312   ;;  %vm376_vm4 = vcmask 326912  }
  0x3a   : > { %v1251_v6 = vld [vmem:[%s1227_s22 + $0x18] sm:$0xff]  ;;  %v254_v7 = vadd.f32 %v1245_v4, %v1240_v2  ;;  %v1256_v8 = vld [vmem:[%s1227_s22 + $0x30] sm:$0xff]  ;;  %v1266_v12 = vld [vmem:[%s1227_s22 + $0x40] sm:$0xff]  ;;  %vm383_vm5 = vcmask 392512   ;;  %vm390_vm6 = vcmask 458112   ;;  %vm397_vm7 = vcmask 523712  }
  0x3b   : > { %v1259_v9 = vld [vmem:[%s1227_s22 + $0x38] sm:$0xff]  ;;  %249 = vadd.xlane.f32.xlu0 %v248_v3  ;;  %v251_v10 = vadd.f32 %v1251_v6, %v1248_v5  ;;  %v1269_v13 = vld [vmem:[%s1227_s22 + $0x48] sm:$0xff]  ;;  %v1272_v14 = vld [vmem:[%s1227_s22 + $0x50] sm:$0xff]  ;;  %vm404_vm8 = vcmask 589312   ;;  %vm411_vm9 = vcmask 654912   ;;  %vm418_vm10 = vcmask 720512  }
  0x3c   : > { %255 = vadd.xlane.f32.xlu1 %v254_v7  ;;  %v257_v11 = vadd.f32 %v1259_v9, %v1256_v8  ;;  %v1275_v15 = vld [vmem:[%s1227_s22 + $0x58] sm:$0xff]  ;;  %v260_v16 = vadd.f32 %v1269_v13, %v1266_v12  ;;  %v1282_v18 = vld [vmem:[%s1227_s22 + $0x60] sm:$0xff]  ;;  %v1285_v19 = vld [vmem:[%s1227_s22 + $0x68] sm:$0xff]  ;;  %vm425_vm11 = vcmask 786112   ;;  %vm432_vm12 = vcmask 851712   ;;  %s1459_s25 = scalar_lea.vmem [#allocation5], %s834_s14 }
  0x3d   : > { %v263_v17 = vadd.f32 %v1275_v15, %v1272_v14  ;;  %v1288_v20 = vld [vmem:[%s1227_s22 + $0x70] sm:$0xff]  ;;  %v1291_v21 = vld [vmem:[%s1227_s22 + $0x78] sm:$0xff]  ;;  %v266_v22 = vadd.f32 %v1285_v19, %v1282_v18  ;;  %v1298_v24 = vld [vmem:[%s1227_s22 + $0x80] sm:$0xff]  ;;  %vm439_vm13 = vcmask 917312   ;;  %vm446_vm14 = vcmask 982912   ;;  %s844_s14 = sshll.u32 %s1138_s19, 12 }
  0x3e   : > { %v269_v23 = vadd.f32 %v1291_v21, %v1288_v20  ;;  %v1301_v25 = vld [vmem:[%s1227_s22 + $0x88] sm:$0xff]  ;;  %v1304_v26 = vld [vmem:[%s1227_s22 + $0x90] sm:$0xff]  ;;  %v1307_v27 = vld [vmem:[%s1227_s22 + $0x98] sm:$0xff]  ;;  %vm453_vm15 = vcmask 1048512   ;;  %s754_s29 = sshll.u32 %s1459_s25, 4  ;;  %s1522_s6 = scalar_lea.hbm %s1576_s4, %s844_s14  ;;  %s1524_s29 = int_to_ptr.vmem [resolvable:$true] %s754_s29 }
  0x3f   : > { %252 = vadd.xlane.f32.xlu0 %v251_v10  ;;  %v272_v28 = vadd.f32 %v1301_v25, %v1298_v24  ;;  %v275_v29 = vadd.f32 %v1307_v27, %v1304_v26  ;;  %v1314_v30 = vld [vmem:[%s1227_s22 + $0xa0] sm:$0xff]  ;;  %v1317_v31 = vld [vmem:[%s1227_s22 + $0xa8] sm:$0xff]  ;;  %v1320_v32 = vld [vmem:[%s1227_s22 + $0xb0] sm:$0xff]  ;;  %s741_s19 = scalar_lea.sflag [#allocation4], %s1221_s13  ;;  %s1015_s7 = scalar_lea.vmem %s1524_s29, 4096 }
  0x40   : > { %258 = vadd.xlane.f32.xlu1 %v257_v11  ;;  %v1323_v33 = vld [vmem:[%s1227_s22 + $0xb8] sm:$0xff]  ;;  %v312_v34 = vld [vmem:[%s1573_s1] sm:$0xff]  ;;  %v313_v35 = vld [vmem:[%s1573_s1 + $0x8] sm:$0xff]  ;;  %v278_v37 = vadd.f32 %v1317_v31, %v1314_v30  ;;  %p1016_p6 = scmp.ne.s32.totalorder %s1524_s29, %s1015_s7  ;;  %p1583_p11 = scmp.ne.s32.totalorder %s1580_s27, 0 }
  0x41   : > { %v905_v36 = vpack.c.bf16 %v313_v35, %v312_v34  ;;  %v281_v39 = vadd.f32 %v1323_v33, %v1320_v32  ;;  %v1336_v40 = vld [vmem:[%s1227_s22 + $0xc0] sm:$0xff]  ;;  %v1339_v41 = vld [vmem:[%s1227_s22 + $0xc8] sm:$0xff]  ;;  %v1342_v42 = vld [vmem:[%s1227_s22 + $0xd0] sm:$0xff]  ;;  %v344_v34 = vlaneseq  ;;  %s1089_s9 = smov [#allocation5]  }
  0x42   : > { %v1345_v43 = vld [vmem:[%s1227_s22 + $0xd8] sm:$0xff]  ;;  %v314_v44 = vld [vmem:[%s1573_s1 + $0x10] sm:$0xff]  ;;  %v284_v47 = vadd.f32 %v1339_v41, %v1336_v40  ;;  %v1358_v49 = vld [vmem:[%s1227_s22 + $0xe0] sm:$0xff]  ;;  %p1017_p12 = pnand %p1016_p6, %p1583_p11  ;;  %s1019_s20 = sshll.u32 %s1089_s9, 4  ;;  %s1020_s20 = int_to_ptr.vmem [resolvable:$false] %s1019_s20 }
  0x43   : > { %261 = vadd.xlane.f32.xlu0 %v260_v16  ;;  %906 = vmatpush3.bf16.msra.mxu0 %v905_v36  ;;  %v315_v45 = vld [vmem:[%s1573_s1 + $0x18] sm:$0xff]  ;;  %v287_v48 = vadd.f32 %v1345_v43, %v1342_v42  ;;  %v1361_v50 = vld [vmem:[%s1227_s22 + $0xe8] sm:$0xff]  ;;  %v1364_v51 = vld [vmem:[%s1227_s22 + $0xf0] sm:$0xff]  ;;  %v1409_v35 = vand.u32 127, %v344_v34  ;;  %v1411_v36 = vshrl.u32 %v344_v34, 7  ;;  %p1022_p8 = scmp.lt.s32.totalorder %s1524_s29, %s1020_s20 }
  0x44   : > { %264 = vadd.xlane.f32.xlu1 %v263_v17  ;;  %907 = vmatprep.subr.bf16.mxu0 %v1086_v38  ;;  %v908_v46 = vpack.c.bf16 %v315_v45, %v314_v44  ;;  %v1367_v52 = vld [vmem:[%s1227_s22 + $0xf8] sm:$0xff]  ;;  %v316_v53 = vld [vmem:[%s1573_s1 + $0x20] sm:$0xff]  ;;  %v317_v54 = vld [vmem:[%s1573_s1 + $0x28] sm:$0xff]  ;;  %v290_v56 = vadd.f32 %v1361_v50, %v1358_v49  ;;  %p1018_p13 = pneg %p1017_p12  ;;  %s1021_s22 = scalar_lea.vmem %s1020_s20, 8192 }
  0x45   : > { %v911_v55 = vpack.c.bf16 %v317_v54, %v316_v53  ;;  %v293_v57 = vadd.f32 %v1367_v52, %v1364_v51  ;;  %v318_v58 = vld [vmem:[%s1573_s1 + $0x30] sm:$0xff]  ;;  %v319_v59 = vld [vmem:[%s1573_s1 + $0x38] sm:$0xff]  ;;  %v320_v61 = vld [vmem:[%s1573_s1 + $0x40] sm:$0xff]  ;;  %v364_v44 = vadd.s32 4294967272, %v1409_v35  ;;  %v371_v53 = vadd.s32 4294967264, %v1409_v35  ;;  %p1023_p10 = scmp.lt.s32.totalorder %s1021_s22, %s1015_s7 }
  0x46   : > { %v914_v60 = vpack.c.bf16 %v319_v59, %v318_v58  ;;  %v321_v62 = vld [vmem:[%s1573_s1 + $0x48] sm:$0xff]  ;;  %v322_v3 = vld [vmem:[%s1573_s1 + $0x50] sm:$0xff]  ;;  %v323_v7 = vld [vmem:[%s1573_s1 + $0x58] sm:$0xff]  ;;  %v378_v58 = vadd.s32 4294967256, %v1409_v35 }
  0x47   : > { %267 = vadd.xlane.f32.xlu0 %v266_v22  ;;  %909 = vmatpush3.bf16.msra.mxu0 %v908_v46  ;;  %v917_v63 = vpack.c.bf16 %v321_v62, %v320_v61  ;;  %v920_v10 = vpack.c.bf16 %v323_v7, %v322_v3  ;;  %v324_v11 = vld [vmem:[%s1573_s1 + $0x60] sm:$0xff]  ;;  %v325_v16 = vld [vmem:[%s1573_s1 + $0x68] sm:$0xff]  ;;  %v326_v22 = vld [vmem:[%s1573_s1 + $0x70] sm:$0xff]  ;;  %v348_v46 = vsub.s32 %v1409_v35, %v1411_v36  ;;  %v385_v7 = vadd.s32 4294967248, %v1409_v35  ;;  %p1024_p0 = por %p1023_p10, %p1022_p8 }
  0x48   : > { %270 = vadd.xlane.f32.xlu1 %v269_v23  ;;  %910 = vmatprep.subr.bf16.mxu0 %v1086_v38  ;;  %v923_v17 = vpack.c.bf16 %v325_v16, %v324_v11  ;;  %v327_v23 = vld [vmem:[%s1573_s1 + $0x78] sm:$0xff]  ;;  %v374_v3 = vsub.s32 %v371_v53, %v1411_v36  ;;  %v406_v53 = vadd.s32 4294967224, %v1409_v35 }
  0x49   : > { %p1025_p2 = pnand %p1024_p0, %p1018_p13 }
  0x4b   : > { %273 = vadd.xlane.f32.xlu0 %v272_v28  ;;  %912 = vmatpush3.bf16.msra.mxu0 %v911_v55  ;;  %v926_v28 = vpack.c.bf16 %v327_v23, %v326_v22  ;;  %v392_v22 = vadd.s32 4294967240, %v1409_v35 }
  0x4c   : > { %276 = vadd.xlane.f32.xlu1 %v275_v29  ;;  %913 = vmatprep.subr.bf16.mxu0 %v1086_v38  ;;  %v1088_v29 = vmov 0.0  }
  0x4d   : > { %896 = vmatprep.mubr.msk.f32.mxu0 %vm1087_vm0, %v1088_v29  ;;  %899 = vmatprep.subr.mxu1 %v1088_v29 }
  0x4e   : > { %901 = vmatprep.mubr.msk.f32.mxu1 %vm1087_vm0, %v1088_v29  ;;  %vm529_vm0 = vcmask 64512  }
  0x4f   : > { %279 = vadd.xlane.f32.xlu0 %v278_v37  ;;  %915 = vmatpush3.bf16.msra.mxu0 %v914_v60  ;;  %v350_v37 = vadd.s32 4294967288, %v1409_v35 }
  0x50   : > { %282 = vadd.xlane.f32.xlu1 %v281_v39  ;;  %916 = vmatprep.subr.bf16.mxu0 %v1086_v38  ;;  %v357_v39 = vadd.s32 4294967280, %v1409_v35 }
  0x52   : > { %v360_v54 = vsub.s32 %v357_v39, %v1411_v36 }
  0x53   : > { %285 = vadd.xlane.f32.xlu0 %v284_v47  ;;  %918 = vmatpush3.bf16.msra.mxu0 %v917_v63 }
  0x54   : > { %288 = vadd.xlane.f32.xlu1 %v287_v48  ;;  %919 = vmatprep.subr.bf16.mxu0 %v1086_v38  ;;  %v353_v48 = vsub.s32 %v350_v37, %v1411_v36 }
  0x57   : > { %291 = vadd.xlane.f32.xlu0 %v290_v56  ;;  %921 = vmatpush3.bf16.msra.mxu0 %v920_v10 }
  0x58   : > { %294 = vadd.xlane.f32.xlu1 %v293_v57  ;;  %922 = vmatprep.subr.bf16.mxu0 %v1086_v38  ;;  %v367_v57 = vsub.s32 %v364_v44, %v1411_v36  ;;  %v388_v44 = vsub.s32 %v385_v7, %v1411_v36  ;;  %v420_v7 = vadd.s32 4294967208, %v1409_v35 }
  0x5b   : > { %924 = vmatpush3.bf16.msra.mxu0 %v923_v17  ;;  %v381_v17 = vsub.s32 %v378_v58, %v1411_v36 }
  0x5c   : > { %925 = vmatprep.subr.bf16.mxu0 %v1086_v38 }
  0x5f   : > { %927 = vmatpush3.bf16.msra.mxu0 %v926_v28 }
  0xc8   : > { %v250_v38 = vpop.xlane.xlu0 %249 }
  0xc9   : > { %v256_v45 = vpop.xlane.xlu1 %255  ;;  %v296_v47 = vmul.f32 0.00390625, %v250_v38 }
  0xca   : > { %v298_v55 = vmul.f32 0.00390625, %v256_v45  ;;  %v399_v45 = vadd.s32 4294967232, %v1409_v35 }
  0xcb   : > { %v349_v62 = vrot.slane %v296_v47, %v348_v46 }
  0xcc   : > { %v253_v56 = vpop.xlane.xlu0 %252  ;;  %v361_v10 = vrot.slane %v298_v55, %v360_v54 }
  0xcd   : > { %v297_v59 = vmul.f32 0.00390625, %v253_v56  ;;  %v259_v60 = vpop.xlane.xlu1 %258 }
  0xce   : > { %v299_v61 = vmul.f32 0.00390625, %v259_v60  ;;  %v413_v60 = vadd.s32 4294967216, %v1409_v35 }
  0xcf   : > { %v354_v63 = vrot.slane %v297_v59, %v353_v48  ;;  %v395_v48 = vsub.s32 %v392_v22, %v1411_v36  ;;  %v402_v59 = vsub.s32 %v399_v45, %v1411_v36 }
  0xd0   : > { %v368_v11 = vrot.slane %v299_v61, %v367_v57  ;;  %v262_v16 = vpop.xlane.xlu0 %261 }
  0xd1   : > { %v356_v23 = vsel %vm355_vm1, %v354_v63, %v349_v62  ;;  %v300_v28 = vmul.f32 0.00390625, %v262_v16  ;;  %v265_v29 = vpop.xlane.xlu1 %264 }
  0xd2   : > { %v363_v34 = vsel %vm362_vm2, %v361_v10, %v356_v23  ;;  %v301_v37 = vmul.f32 0.00390625, %v265_v29  ;;  %v416_v23 = vsub.s32 %v413_v60, %v1411_v36 }
  0xd3   : > { %v370_v38 = vsel %vm369_vm3, %v368_v11, %v363_v34  ;;  %v375_v39 = vrot.slane %v300_v28, %v374_v3  ;;  %v409_v3 = vsub.s32 %v406_v53, %v1411_v36  ;;  %v427_v28 = vadd.s32 4294967200, %v1409_v35 }
  0xd4   : > { %v382_v46 = vrot.slane %v301_v37, %v381_v17  ;;  %v268_v47 = vpop.xlane.xlu0 %267 }
  0xd5   : > { %v377_v54 = vsel %vm376_vm4, %v375_v39, %v370_v38  ;;  %v302_v55 = vmul.f32 0.00390625, %v268_v47  ;;  %v271_v56 = vpop.xlane.xlu1 %270  ;;  %v423_v38 = vsub.s32 %v420_v7, %v1411_v36  ;;  %v434_v39 = vadd.s32 4294967192, %v1409_v35 }
  0xd6   : > { %v303_v57 = vmul.f32 0.00390625, %v271_v56  ;;  %v384_v61 = vsel %vm383_vm5, %v382_v46, %v377_v54  ;;  %v430_v53 = vsub.s32 %v427_v28, %v1411_v36  ;;  %v441_v54 = vadd.s32 4294967184, %v1409_v35 }
  0xd7   : > { %v389_v58 = vrot.slane %v302_v55, %v388_v44 }
  0xd8   : > { %v396_v62 = vrot.slane %v303_v57, %v395_v48  ;;  %v274_v63 = vpop.xlane.xlu0 %273  ;;  %v444_v7 = vsub.s32 %v441_v54, %v1411_v36 }
  0xd9   : > { %v391_v10 = vsel %vm390_vm6, %v389_v58, %v384_v61  ;;  %v304_v11 = vmul.f32 0.00390625, %v274_v63  ;;  %v277_v16 = vpop.xlane.xlu1 %276  ;;  %v437_v58 = vsub.s32 %v434_v39, %v1411_v36 }
  0xda   : > { %v305_v17 = vmul.f32 0.00390625, %v277_v16  ;;  %v398_v29 = vsel %vm397_vm7, %v396_v62, %v391_v10 }
  0xdb   : > { %v403_v22 = vrot.slane %v304_v11, %v402_v59  ;;  %v448_v59 = vadd.s32 4294967176, %v1409_v35 }
  0xdc   : > { %v410_v34 = vrot.slane %v305_v17, %v409_v3  ;;  %v280_v37 = vpop.xlane.xlu0 %279 }
  0xdd   : > { %v405_v44 = vsel %vm404_vm8, %v403_v22, %v398_v29  ;;  %v306_v45 = vmul.f32 0.00390625, %v280_v37  ;;  %v283_v46 = vpop.xlane.xlu1 %282  ;;  %v451_v17 = vsub.s32 %v448_v59, %v1411_v36  ;;  %v611_v59 = vsub.s32 0, %v1411_v36 }
  0xde   : > { %v307_v47 = vmul.f32 0.00390625, %v283_v46  ;;  %v412_v55 = vsel %vm411_vm9, %v410_v34, %v405_v44  ;;  %v527_v44 = vld [vmem:[%s1574_s2] sm:$0xff] }
  0xdf   : > { %v417_v48 = vrot.slane %v306_v45, %v416_v23  ;;  %900 = vmatpush3.msra.mxu1 %v527_v44 }
  0xe0   : > { %v424_v56 = vrot.slane %v307_v47, %v423_v38  ;;  %v286_v57 = vpop.xlane.xlu0 %285 }
  0xe1   : > { %v419_v60 = vsel %vm418_vm10, %v417_v48, %v412_v55  ;;  %v308_v61 = vmul.f32 0.00390625, %v286_v57  ;;  %v289_v62 = vpop.xlane.xlu1 %288  ;;  %v528_v48 = vld [vmem:[%s1575_s3] sm:$0x1] }
  0xe2   : > { %v309_v63 = vmul.f32 0.00390625, %v289_v62  ;;  %v426_v10 = vsel %vm425_vm11, %v424_v56, %v419_v60 }
  0xe3   : > { %v431_v3 = vrot.slane %v308_v61, %v430_v53 }
  0xe4   : > { %v438_v11 = vrot.slane %v309_v63, %v437_v58  ;;  %v292_v16 = vpop.xlane.xlu0 %291 }
  0xe5   : > { %v433_v22 = vsel %vm432_vm12, %v431_v3, %v426_v10  ;;  %v310_v23 = vmul.f32 0.00390625, %v292_v16  ;;  %v295_v28 = vpop.xlane.xlu1 %294 }
  0xe6   : > { %v311_v29 = vmul.f32 0.00390625, %v295_v28  ;;  %v440_v37 = vsel %vm439_vm13, %v438_v11, %v433_v22 }
  0xe7   : > { %v445_v35 = vrot.slane %v310_v23, %v444_v7 }
  0xe8   : > { %v452_v34 = vrot.slane %v311_v29, %v451_v17 }
  0xe9   : > { %v447_v38 = vsel %vm446_vm14, %v445_v35, %v440_v37 }
  0xea   : > { %v454_v39 = vsel %vm453_vm15, %v452_v34, %v447_v38 }
  0xeb   : > { %897 = vmatmul.mubr.f32.vlgmr.msra.gmra.mrb[0].mxu0 %v454_v39 }
 0x1be   : > { %v522_v45 = vpop.f32.mrb[0].mxu0 }
 0x1bf   : > { %v526_v46 = vmax.f32 %v522_v45, 0.0  ;;  %v898_v47 = vpop.f32.mrb[1].mxu0 }
 0x1c1   : > { %902 = vmatmul.mubr.msk.f32.vlgmr.msra.gmra.mrb[0].mxu1 %vm529_vm0, %v526_v46 }
 0x294   : > { %v599_v53 = vpop.f32.mrb[0].mxu1 }
 0x295   : > { %v600_v54 = vadd.f32 %v599_v53, %v528_v48  ;;  %v903_v55 = vpop.f32.mrb[1].mxu1 }
 0x297   : > { %v837_v56 = vmul.f32 -1.442695, %v600_v54 }
 0x299   : > { %981 = vpow2.f32 %v837_v56 }
 0x2a3   : > { %v982_v57 = vpop.eup %981 }
 0x2a4   : > { %v606_v58 = vadd.f32 1.0, %v982_v57 }
 0x2a6   : > { %983 = vrcp.f32 %v606_v58 }
 0x2b0   : > { %v984_v60 = vpop.eup %983 }
 0x2b1   : > { %v612_v61 = vrot.slane %v984_v60, %v611_v59 }
 0x2b3   : > { %618 = vbcast.lane.b32.xlu1 %v612_v61, 264  ;;  %614 = vbcast.lane.b32.xlu0 %v612_v61, 256 }
 0x2b7   : > { %622 = vbcast.lane.b32.xlu1 %v612_v61, 272  ;;  %630 = vbcast.lane.b32.xlu0 %v612_v61, 288 }
 0x2bb   : > { %626 = vbcast.lane.b32.xlu1 %v612_v61, 280  ;;  %638 = vbcast.lane.b32.xlu0 %v612_v61, 304 }
 0x2bf   : > { %634 = vbcast.lane.b32.xlu1 %v612_v61, 296  ;;  %646 = vbcast.lane.b32.xlu0 %v612_v61, 320 }
 0x2c3   : > { %642 = vbcast.lane.b32.xlu1 %v612_v61, 312  ;;  %654 = vbcast.lane.b32.xlu0 %v612_v61, 336 }
 0x2c7   : > { %650 = vbcast.lane.b32.xlu1 %v612_v61, 328  ;;  %662 = vbcast.lane.b32.xlu0 %v612_v61, 352 }
 0x2cb   : > { %658 = vbcast.lane.b32.xlu1 %v612_v61, 344  ;;  %670 = vbcast.lane.b32.xlu0 %v612_v61, 368 }
 0x2cf   : > { %666 = vbcast.lane.b32.xlu1 %v612_v61, 360 }
 0x2d3   : > { %674 = vbcast.lane.b32.xlu1 %v612_v61, 376 }
 0x325   : > { %v619_v36 = vpop.permute.xlu1 %618  ;;  %v615_v62 = vpop.permute.xlu0 %614 }
 0x326   : > { %v678_v63 = vmul.f32 %v619_v36, %v1248_v5  ;;  %v679_v3 = vmul.f32 %v619_v36, %v1251_v6  ;;  %v676_v7 = vmul.f32 %v615_v62, %v1234_v0  ;;  %v677_v10 = vmul.f32 %v615_v62, %v1237_v1 }
 0x328   : > { %710 = vst [vmem:[%s1459_s25 + $0x10] sm:$0xff] %v678_v63  ;;  %711 = vst [vmem:[%s1459_s25 + $0x18] sm:$0xff] %v679_v3 }
 0x329   : > { %708 = vst [vmem:[%s1459_s25] sm:$0xff] %v676_v7  ;;  %709 = vst [vmem:[%s1459_s25 + $0x8] sm:$0xff] %v677_v10  ;;  %v623_v5 = vpop.permute.xlu1 %622  ;;  %v631_v0 = vpop.permute.xlu0 %630 }
 0x32a   : > { %v680_v1 = vmul.f32 %v623_v5, %v1240_v2  ;;  %v681_v6 = vmul.f32 %v623_v5, %v1245_v4  ;;  %v684_v11 = vmul.f32 %v631_v0, %v1266_v12  ;;  %v685_v16 = vmul.f32 %v631_v0, %v1269_v13 }
 0x32c   : > { %712 = vst [vmem:[%s1459_s25 + $0x20] sm:$0xff] %v680_v1  ;;  %713 = vst [vmem:[%s1459_s25 + $0x28] sm:$0xff] %v681_v6 }
 0x32d   : > { %716 = vst [vmem:[%s1459_s25 + $0x40] sm:$0xff] %v684_v11  ;;  %717 = vst [vmem:[%s1459_s25 + $0x48] sm:$0xff] %v685_v16  ;;  %v627_v17 = vpop.permute.xlu1 %626  ;;  %v639_v22 = vpop.permute.xlu0 %638 }
 0x32e   : > { %v682_v23 = vmul.f32 %v627_v17, %v1256_v8  ;;  %v683_v2 = vmul.f32 %v627_v17, %v1259_v9  ;;  %v688_v4 = vmul.f32 %v639_v22, %v1282_v18  ;;  %v689_v12 = vmul.f32 %v639_v22, %v1285_v19 }
 0x330   : > { %714 = vst [vmem:[%s1459_s25 + $0x30] sm:$0xff] %v682_v23  ;;  %715 = vst [vmem:[%s1459_s25 + $0x38] sm:$0xff] %v683_v2 }
 0x331   : > { %720 = vst [vmem:[%s1459_s25 + $0x60] sm:$0xff] %v688_v4  ;;  %721 = vst [vmem:[%s1459_s25 + $0x68] sm:$0xff] %v689_v12  ;;  %v635_v13 = vpop.permute.xlu1 %634  ;;  %v647_v28 = vpop.permute.xlu0 %646 }
 0x332   : > { %v686_v29 = vmul.f32 %v635_v13, %v1272_v14  ;;  %v687_v8 = vmul.f32 %v635_v13, %v1275_v15  ;;  %v692_v9 = vmul.f32 %v647_v28, %v1298_v24  ;;  %v693_v18 = vmul.f32 %v647_v28, %v1301_v25 }
 0x334   : > { %718 = vst [vmem:[%s1459_s25 + $0x50] sm:$0xff] %v686_v29  ;;  %719 = vst [vmem:[%s1459_s25 + $0x58] sm:$0xff] %v687_v8 }
 0x335   : > { %724 = vst [vmem:[%s1459_s25 + $0x80] sm:$0xff] %v692_v9  ;;  %725 = vst [vmem:[%s1459_s25 + $0x88] sm:$0xff] %v693_v18  ;;  %v643_v19 = vpop.permute.xlu1 %642  ;;  %v655_v35 = vpop.permute.xlu0 %654 }
 0x336   : > { %v690_v34 = vmul.f32 %v643_v19, %v1288_v20  ;;  %v691_v14 = vmul.f32 %v643_v19, %v1291_v21  ;;  %v696_v15 = vmul.f32 %v655_v35, %v1314_v30  ;;  %v697_v24 = vmul.f32 %v655_v35, %v1317_v31 }
 0x338   : > { %722 = vst [vmem:[%s1459_s25 + $0x70] sm:$0xff] %v690_v34  ;;  %723 = vst [vmem:[%s1459_s25 + $0x78] sm:$0xff] %v691_v14 }
 0x339   : > { %728 = vst [vmem:[%s1459_s25 + $0xa0] sm:$0xff] %v696_v15  ;;  %729 = vst [vmem:[%s1459_s25 + $0xa8] sm:$0xff] %v697_v24  ;;  %v651_v25 = vpop.permute.xlu1 %650  ;;  %v663_v37 = vpop.permute.xlu0 %662 }
 0x33a   : > { %v694_v38 = vmul.f32 %v651_v25, %v1304_v26  ;;  %v695_v20 = vmul.f32 %v651_v25, %v1307_v27  ;;  %v700_v21 = vmul.f32 %v663_v37, %v1336_v40  ;;  %v701_v30 = vmul.f32 %v663_v37, %v1339_v41 }
 0x33c   : > { %726 = vst [vmem:[%s1459_s25 + $0x90] sm:$0xff] %v694_v38  ;;  %727 = vst [vmem:[%s1459_s25 + $0x98] sm:$0xff] %v695_v20 }
 0x33d   : > { %732 = vst [vmem:[%s1459_s25 + $0xc0] sm:$0xff] %v700_v21  ;;  %733 = vst [vmem:[%s1459_s25 + $0xc8] sm:$0xff] %v701_v30  ;;  %v659_v31 = vpop.permute.xlu1 %658  ;;  %v671_v39 = vpop.permute.xlu0 %670 }
 0x33e   : > { %v698_v26 = vmul.f32 %v659_v31, %v1320_v32  ;;  %v699_v44 = vmul.f32 %v659_v31, %v1323_v33  ;;  %v704_v27 = vmul.f32 %v671_v39, %v1358_v49  ;;  %v705_v40 = vmul.f32 %v671_v39, %v1361_v50 }
 0x340   : > { %730 = vst [vmem:[%s1459_s25 + $0xb0] sm:$0xff] %v698_v26  ;;  %731 = vst [vmem:[%s1459_s25 + $0xb8] sm:$0xff] %v699_v44 }
 0x341   : > { %736 = vst [vmem:[%s1459_s25 + $0xe0] sm:$0xff] %v704_v27  ;;  %737 = vst [vmem:[%s1459_s25 + $0xe8] sm:$0xff] %v705_v40  ;;  %v667_v41 = vpop.permute.xlu1 %666 }
 0x342   : > { %v702_v45 = vmul.f32 %v667_v41, %v1342_v42  ;;  %v703_v46 = vmul.f32 %v667_v41, %v1345_v43 }
 0x344   : > { %734 = vst [vmem:[%s1459_s25 + $0xd0] sm:$0xff] %v702_v45  ;;  %735 = vst [vmem:[%s1459_s25 + $0xd8] sm:$0xff] %v703_v46 }
 0x345   : > { %v675_v32 = vpop.permute.xlu1 %674 }
 0x346   : > { %v706_v33 = vmul.f32 %v675_v32, %v1364_v51  ;;  %v707_v42 = vmul.f32 %v675_v32, %v1367_v52 }
 0x348   : > { %738 = vst [vmem:[%s1459_s25 + $0xf0] sm:$0xff] %v706_v33  ;;  %739 = vst [vmem:[%s1459_s25 + $0xf8] sm:$0xff] %v707_v42 }
 0x349   : > { %1028 = shalt.err (!%p1025_p2)
}
 0x34a   : > { %s1029_s26 = scalar_lea.hbm %s1522_s6, 4096  ;;  %s1033_s11 = scalar_lea.hbm %s1576_s4, 8192 }
 0x34b   : > { %p1030_p4 = scmp.ne.s32.totalorder %s1522_s6, %s1029_s26  ;;  %p1034_p9 = scmp.lt.u32.totalorder %s1522_s6, %s1576_s4 }
 0x34c   : > { %p1035_p1 = scmp.lt.u32.totalorder %s1033_s11, %s1029_s26  ;;  %p1037_p6 = scmp.lt.u32.totalorder %s1029_s26, %s1522_s6 }
 0x34d   : > { %p1031_p5 = pnand %p1030_p4, %p1583_p11 }
 0x34e   : > { %p1036_p3 = por %p1035_p1, %p1034_p9 }
 0x34f   : > { %p1032_p7 = pneg %p1031_p5 }
 0x350   : > { %p1038_p12 = por %p1037_p6, %p1036_p3 }
 0x352   : > { %p1039_p13 = pnand %p1038_p12, %p1032_p7 }
 0x354   : > { %1042 = shalt.err (!%p1039_p13)
}
 0x355   : > { %s1090_s25 = smov 256   ;;  %s1091_s14 = smov 16  }
 0x356   : > { %930 = dma.vmem_to_hbm [thread:$0]  (%p1583_p11), %s1524_s29, 4096, %s1522_s6, %s741_s19, %s1090_s25, %s1090_s25, %s1091_s14  }
 0x357 PF: > { %s769_s30 = sand.u32 1, %s1069_s15   ;;  %p1584_p8 = scmp.ne.s32.totalorder %s1581_s28, 0 }
 0x358   : > { %p1585_p10 = scmp.ge.s32.totalorder %s1081_s18, 2  ;;  %s770_s5 = scalar_lea.sflag [#allocation4], %s769_s30 }
 0x35a   : > { %p937_p0 = pnand %p1585_p10, %p1584_p8 }
 0x35c   : > { %1064 = dma.done.wait (!%p937_p0), %s770_s5, 4096  }
 0x35d   : > { %1066 = vsyncadd (!%p937_p0), %s770_s5, 4294963200  ;;  %p17_p2 = scmp.ge.s32.totalorder %s1142_s21, 4   ;;  %s1586_s15 = smov %s1073_s16 }
 0x35e   : > { %s1587_s16 = smov %s1077_s17  ;;  %s1588_s17 = smov %s1154_s24 }
 0x35f   : > { %s1589_s18 = smov %s1142_s21  ;;  %19 = sbr.rel (!%p17_p2) target bundleno = 5 (0x5), region = 81 }
 0x366   :  { %775 = vsyncpa [#allocation3], 1 }
 0x367   :  { %777 = vsyncpa [#allocation3 + $0x1], 1 }
 0x368   :  { %778 = vsyncpa [#allocation4], 1 }
 0x369   :  { %780 = vsyncpa [#allocation4 + $0x1], 1 }

</bundles_post_ra>
